<compile_context>
chip_gen: v7x
topology: tpu7x:2x2x1
jax: 0.10.0
libtpu: 0.0.40
codegen_flags: <defaults>
</compile_context>

<pallas_src>
import numpy as np
import jax
import jax.numpy as jnp
from jax.experimental import pallas as pl
from jax.experimental.pallas import tpu as pltpu


LANE = 128


def _round_up(x, m):
    return ((x + m - 1) // m) * m


def _cdiv(a, b):
    return -(-a // b)


# ----------------------------------------------------------------------------
# Pallas kernel: fused 3-layer MLP on one batch tile
# ----------------------------------------------------------------------------
def policy_net_kernel(obs_ref, w1_ref, b1_ref, w2_ref, b2_ref, w3_ref, b3_ref,
                      out_ref):
    # obs arrives as f32; cast to bf16 for the MXU (VPU cast is effectively free).
    x = obs_ref[...].astype(jnp.bfloat16)                       # (TB, in_dim)

    # layer1 + ReLU  (bf16 MXU matmul, f32 accumulate, f32 elementwise)
    h1 = jnp.dot(x, w1_ref[...], preferred_element_type=jnp.float32)
    h1 = jnp.maximum(h1 + b1_ref[...], 0.0).astype(jnp.bfloat16)  # (TB, HID_P)

    # layer2 + ReLU
    h2 = jnp.dot(h1, w2_ref[...], preferred_element_type=jnp.float32)
    h2 = jnp.maximum(h2 + b2_ref[...], 0.0).astype(jnp.bfloat16)  # (TB, HID_P)

    # layer3 (no activation), narrow logical-width output
    out = jnp.dot(h2, w3_ref[...], preferred_element_type=jnp.float32)
    out_ref[...] = (out + b3_ref[...]).astype(out_ref.dtype)      # (TB, out_dim)


# ----------------------------------------------------------------------------
# One-time parameter preparation (pad hidden dim to 128 lanes, cast to bf16)
# ----------------------------------------------------------------------------
def _pad_cast_2d(a, shape, dtype):
    out = jnp.zeros(shape, dtype)
    return out.at[: a.shape[0], : a.shape[1]].set(a.astype(dtype))


def prepare_policy_net_params(params):
    """Pad/cast parameters ONCE (call at init, reuse on every forward)."""
    w1, b1, w2, b2, w3, b3 = params
    in_dim, hid = w1.shape
    out_dim = w3.shape[1]
    HID_P = _round_up(hid, LANE)                     # 64 -> 128 lanes

    w1p = _pad_cast_2d(w1, (in_dim, HID_P), jnp.bfloat16)
    w2p = _pad_cast_2d(w2, (HID_P, HID_P), jnp.bfloat16)
    w3p = _pad_cast_2d(w3, (HID_P, out_dim), jnp.bfloat16)   # out dim stays logical
    b1p = _pad_cast_2d(b1, (1, HID_P), jnp.float32)
    b2p = _pad_cast_2d(b2, (1, HID_P), jnp.float32)
    b3p = b3.astype(jnp.float32).reshape(1, out_dim)
    return (w1p, b1p, w2p, b2p, w3p, b3p)


# ----------------------------------------------------------------------------
# Wrapper: tile the batch, call pallas_call
# ----------------------------------------------------------------------------
def policy_net_forward(obs, padded_params, *, tb=2048):
    """Fused PolicyNet forward. obs: (B, in_dim) f32 -> (B, out_dim) f32.

    `padded_params` must come from prepare_policy_net_params().
    """
    w1p, b1p, w2p, b2p, w3p, b3p = padded_params
    B, in_dim = obs.shape
    HID_P = w1p.shape[1]
    out_dim = w3p.shape[1]

    # Tile choice: at least 2 tiles (v7x has 2 TCs), last tile not mostly
    # padding, TB always a multiple of 8 sublanes.
    n_desired = max(2, _cdiv(B, tb))
    TB = max(8, _round_up(_cdiv(B, n_desired), 8))
    n_tiles = _cdiv(B, TB)
    B_pad = n_tiles * TB

    # Only pad the batch (zero rows), and only when needed. No dtype pass.
    obs_p = obs if B_pad == B else jnp.pad(obs, ((0, B_pad - B), (0, 0)))

    resident = lambda shape: pl.BlockSpec(shape, lambda i: (0, 0))

    out_p = pl.pallas_call(
        policy_net_kernel,
        out_shape=jax.ShapeDtypeStruct((B_pad, out_dim), jnp.float32),
        grid=(n_tiles,),
        in_specs=[
            pl.BlockSpec((TB, in_dim), lambda i: (i, 0)),   # obs tile streams (f32)
            resident((in_dim, HID_P)),                      # w1 stays in VMEM
            resident((1, HID_P)),                           # b1
            resident((HID_P, HID_P)),                       # w2
            resident((1, HID_P)),                           # b2
            resident((HID_P, out_dim)),                     # w3 (narrow N)
            resident((1, out_dim)),                         # b3
        ],
        out_specs=pl.BlockSpec((TB, out_dim), lambda i: (i, 0)),  # logical width
        compiler_params=pltpu.CompilerParams(
            dimension_semantics=("parallel",),              # shard tiles on v7x's 2 TCs
        ),
    )(obs_p, w1p, b1p, w2p, b2p, w3p, b3p)

    return out_p if B_pad == B else out_p[:B]


# ----------------------------------------------------------------------------
# Deterministic parameter init (mimics layer_init: orthogonal * std, bias = 0)
# ----------------------------------------------------------------------------
def orthogonal(key, fan_in, fan_out, std):
    a = jax.random.normal(key, (max(fan_in, fan_out), min(fan_in, fan_out)),
                          dtype=jnp.float32)
    q, r = jnp.linalg.qr(a)
    d = jnp.diagonal(r)
    q = q * jnp.where(d >= 0.0, 1.0, -1.0)      # deterministic sign, never zero
    w = q if fan_in >= fan_out else q.T         # (fan_in, fan_out)
    return (std * w).astype(jnp.float32)


def init_policy_net_params(key, in_dim, out_dim):
    k1, k2, k3 = jax.random.split(key, 3)
    std_hidden = float(np.sqrt(2.0))
    w1 = orthogonal(k1, in_dim, 64, std_hidden)
    b1 = jnp.zeros((1, 64), jnp.float32)
    w2 = orthogonal(k2, 64, 64, std_hidden)
    b2 = jnp.zeros((1, 64), jnp.float32)
    w3 = orthogonal(k3, 64, out_dim, 0.01)
    b3 = jnp.zeros((1, out_dim), jnp.float32)
    return (w1, b1, w2, b2, w3, b3)


# ----------------------------------------------------------------------------
# Plain-JAX reference mirroring the kernel's bf16-operand / f32-accumulate math
# (NOTE: matches an f32 PyTorch PolicyNet only to ~1e-2 due to bf16 operands.)
# ----------------------------------------------------------------------------
def policy_net_ref(obs, params):
    w1, b1, w2, b2, w3, b3 = params
    bf = jnp.bfloat16
    x = obs.astype(bf)
    h1 = jnp.dot(x, w1.astype(bf), preferred_element_type=jnp.float32) + b1
    h1 = jnp.maximum(h1, 0.0).astype(bf)
    h2 = jnp.dot(h1, w2.astype(bf), preferred_element_type=jnp.float32) + b2
    h2 = jnp.maximum(h2, 0.0).astype(bf)
    return jnp.dot(h2, w3.astype(bf), preferred_element_type=jnp.float32) + b3


if __name__ == "__main__":
    key = jax.random.PRNGKey(0)
    k_obs, k_params = jax.random.split(key)

    # PPO-style minibatch: B not a multiple of the tile, tiny obs/action dims.
    B, in_dim, out_dim = 300, 16, 4
    obs = jax.random.normal(k_obs, (B, in_dim), dtype=jnp.float32)
    params = init_policy_net_params(k_params, in_dim, out_dim)
    padded_params = prepare_policy_net_params(params)   # once, reused per call

    ref = np.asarray(policy_net_ref(obs, params))

    # Small tb -> 3 grid steps (TB=104, B_pad=312): exercises tiling + batch pad.
    out_small = jax.block_until_ready(
        policy_net_forward(obs, padded_params, tb=128))
    assert out_small.shape == (B, out_dim)
    np.testing.assert_allclose(np.asarray(out_small), ref, rtol=1e-3, atol=1e-3)

    # Default tb=2048 -> 2 grid steps (TB=152), both TCs busy on v7x.
    out_default = jax.block_until_ready(
        policy_net_forward(obs, padded_params))
    assert out_default.shape == (B, out_dim)
    np.testing.assert_allclose(np.asarray(out_default), ref, rtol=1e-3, atol=1e-3)

    print("KERNEL_OK")
</pallas_src>

<mosaic_0001>
module attributes {stable_mosaic.version = 11 : i64} {
  func.func @policy_net_kernel(%arg0: i32, %arg1: memref<104x16xf32, #tpu.memory_space<vmem>>, %arg2: memref<16x128xbf16, #tpu.memory_space<vmem>>, %arg3: memref<1x128xf32, #tpu.memory_space<vmem>>, %arg4: memref<128x128xbf16, #tpu.memory_space<vmem>>, %arg5: memref<1x128xf32, #tpu.memory_space<vmem>>, %arg6: memref<128x4xbf16, #tpu.memory_space<vmem>>, %arg7: memref<1x4xf32, #tpu.memory_space<vmem>>, %arg8: memref<104x4xf32, #tpu.memory_space<vmem>>) attributes {dimension_semantics = [#tpu.dimension_semantics<parallel>], iteration_bounds = array<i64: 3>, scalar_prefetch = 0 : i64, scratch_operands = 0 : i64, tpu.core_type = #tpu.core_type<tc>, window_params = [{transform_indices = @transform_0, window_bounds = array<i64: 104, 16>}, {pipeline_mode = #tpu.pipeline_mode<synchronous>, transform_indices = @transform_1, window_bounds = array<i64: 16, 128>}, {pipeline_mode = #tpu.pipeline_mode<synchronous>, transform_indices = @transform_2, window_bounds = array<i64: 1, 128>}, {pipeline_mode = #tpu.pipeline_mode<synchronous>, transform_indices = @transform_3, window_bounds = array<i64: 128, 128>}, {pipeline_mode = #tpu.pipeline_mode<synchronous>, transform_indices = @transform_4, window_bounds = array<i64: 1, 128>}, {pipeline_mode = #tpu.pipeline_mode<synchronous>, transform_indices = @transform_5, window_bounds = array<i64: 128, 4>}, {pipeline_mode = #tpu.pipeline_mode<synchronous>, transform_indices = @transform_6, window_bounds = array<i64: 1, 4>}, {transform_indices = @transform_7, window_bounds = array<i64: 104, 4>}]} {
    %c0 = arith.constant 0 : index
    %c0_0 = arith.constant 0 : index
    %0 = vector.load %arg1[%c0, %c0_0] : memref<104x16xf32, #tpu.memory_space<vmem>>, vector<104x16xf32>
    %1 = arith.truncf %0 : vector<104x16xf32> to vector<104x16xbf16>
    %c0_1 = arith.constant 0 : index
    %c0_2 = arith.constant 0 : index
    %2 = vector.load %arg2[%c0_1, %c0_2] : memref<16x128xbf16, #tpu.memory_space<vmem>>, vector<16x128xbf16>
    %cst = arith.constant dense<0.000000e+00> : vector<104x128xf32>
    %3 = tpu.matmul %1, %2, %cst {dimension_numbers = #tpu.dot_dimension_numbers<[1], [0], [0], [1], [0, 0, 1, 1], [], []>} : vector<104x16xbf16>, vector<16x128xbf16>, vector<104x128xf32> -> vector<104x128xf32>
    %c0_3 = arith.constant 0 : index
    %c0_4 = arith.constant 0 : index
    %4 = vector.load %arg3[%c0_3, %c0_4] : memref<1x128xf32, #tpu.memory_space<vmem>>, vector<1x128xf32>
    %5 = vector.broadcast %4 : vector<1x128xf32> to vector<104x128xf32>
    %6 = arith.addf %3, %5 : vector<104x128xf32>
    %cst_5 = arith.constant 0.000000e+00 : f32
    %7 = vector.broadcast %cst_5 : f32 to vector<104x128xf32>
    %8 = arith.maximumf %6, %7 : vector<104x128xf32>
    %9 = arith.truncf %8 : vector<104x128xf32> to vector<104x128xbf16>
    %c0_6 = arith.constant 0 : index
    %c0_7 = arith.constant 0 : index
    %10 = vector.load %arg4[%c0_6, %c0_7] : memref<128x128xbf16, #tpu.memory_space<vmem>>, vector<128x128xbf16>
    %cst_8 = arith.constant dense<0.000000e+00> : vector<104x128xf32>
    %11 = tpu.matmul %9, %10, %cst_8 {dimension_numbers = #tpu.dot_dimension_numbers<[1], [0], [0], [1], [0, 0, 1, 1], [], []>} : vector<104x128xbf16>, vector<128x128xbf16>, vector<104x128xf32> -> vector<104x128xf32>
    %c0_9 = arith.constant 0 : index
    %c0_10 = arith.constant 0 : index
    %12 = vector.load %arg5[%c0_9, %c0_10] : memref<1x128xf32, #tpu.memory_space<vmem>>, vector<1x128xf32>
    %13 = vector.broadcast %12 : vector<1x128xf32> to vector<104x128xf32>
    %14 = arith.addf %11, %13 : vector<104x128xf32>
    %cst_11 = arith.constant 0.000000e+00 : f32
    %15 = vector.broadcast %cst_11 : f32 to vector<104x128xf32>
    %16 = arith.maximumf %14, %15 : vector<104x128xf32>
    %17 = arith.truncf %16 : vector<104x128xf32> to vector<104x128xbf16>
    %c0_12 = arith.constant 0 : index
    %c0_13 = arith.constant 0 : index
    %18 = vector.load %arg6[%c0_12, %c0_13] : memref<128x4xbf16, #tpu.memory_space<vmem>>, vector<128x4xbf16>
    %cst_14 = arith.constant dense<0.000000e+00> : vector<104x4xf32>
    %19 = tpu.matmul %17, %18, %cst_14 {dimension_numbers = #tpu.dot_dimension_numbers<[1], [0], [0], [1], [0, 0, 1, 1], [], []>} : vector<104x128xbf16>, vector<128x4xbf16>, vector<104x4xf32> -> vector<104x4xf32>
    %c0_15 = arith.constant 0 : index
    %c0_16 = arith.constant 0 : index
    %20 = vector.load %arg7[%c0_15, %c0_16] : memref<1x4xf32, #tpu.memory_space<vmem>>, vector<1x4xf32>
    %21 = vector.broadcast %20 : vector<1x4xf32> to vector<104x4xf32>
    %22 = arith.addf %19, %21 : vector<104x4xf32>
    %c0_17 = arith.constant 0 : index
    %c0_18 = arith.constant 0 : index
    %23 = vector.load %arg8[%c0_17, %c0_18] : memref<104x4xf32, #tpu.memory_space<vmem>>, vector<104x4xf32>
    tpu.vector_store %arg8[%c0_17, %c0_18], %22 {strides = array<i32>} : memref<104x4xf32, #tpu.memory_space<vmem>>, vector<104x4xf32>,
    return
  }
  func.func @transform_0(%arg0: i32) -> (i32, i32) {
    %c0_i32 = arith.constant 0 : i32
    %c0_i32_0 = arith.constant 0 : i32
    return %arg0, %c0_i32 : i32, i32
  }
  func.func @transform_1(%arg0: i32) -> (i32, i32) {
    %c0_i32 = arith.constant 0 : i32
    %c0_i32_0 = arith.constant 0 : i32
    %c0_i32_1 = arith.constant 0 : i32
    return %c0_i32, %c0_i32_0 : i32, i32
  }
  func.func @transform_2(%arg0: i32) -> (i32, i32) {
    %c0_i32 = arith.constant 0 : i32
    %c0_i32_0 = arith.constant 0 : i32
    %c0_i32_1 = arith.constant 0 : i32
    return %c0_i32, %c0_i32_0 : i32, i32
  }
  func.func @transform_3(%arg0: i32) -> (i32, i32) {
    %c0_i32 = arith.constant 0 : i32
    %c0_i32_0 = arith.constant 0 : i32
    %c0_i32_1 = arith.constant 0 : i32
    return %c0_i32, %c0_i32_0 : i32, i32
  }
  func.func @transform_4(%arg0: i32) -> (i32, i32) {
    %c0_i32 = arith.constant 0 : i32
    %c0_i32_0 = arith.constant 0 : i32
    %c0_i32_1 = arith.constant 0 : i32
    return %c0_i32, %c0_i32_0 : i32, i32
  }
  func.func @transform_5(%arg0: i32) -> (i32, i32) {
    %c0_i32 = arith.constant 0 : i32
    %c0_i32_0 = arith.constant 0 : i32
    %c0_i32_1 = arith.constant 0 : i32
    return %c0_i32, %c0_i32_0 : i32, i32
  }
  func.func @transform_6(%arg0: i32) -> (i32, i32) {
    %c0_i32 = arith.constant 0 : i32
    %c0_i32_0 = arith.constant 0 : i32
    %c0_i32_1 = arith.constant 0 : i32
    return %c0_i32, %c0_i32_0 : i32, i32
  }
  func.func @transform_7(%arg0: i32) -> (i32, i32) {
    %c0_i32 = arith.constant 0 : i32
    %c0_i32_0 = arith.constant 0 : i32
    return %arg0, %c0_i32 : i32, i32
  }
}

</mosaic_0001>

<bundles_post_ra>
// kernel: tpu_custom_call.1
= control target key start
LH: loop header
LB: loop body
LE: loop exit
PB: predicated region body
PF: predicated region fallthrough
CT: control target
= control target key end

     0   :  { %s1127_s24 = smov 0   ;;  %s1351_s0 = inlined_call_operand.vmem [shape: f32[312,16], index: 0, kind: input, shape index: {}]   ;;  %s1352_s1 = inlined_call_operand.vmem [shape: bf16[16,128], index: 1, kind: input, shape index: {}]   ;;  %s1353_s2 = inlined_call_operand.vmem [shape: f32[1,128], index: 2, kind: input, shape index: {}]   ;;  %s1354_s3 = inlined_call_operand.vmem [shape: bf16[128,128], index: 3, kind: input, shape index: {}]   ;;  %s1355_s4 = inlined_call_operand.vmem [shape: f32[1,128], index: 4, kind: input, shape index: {}]   ;;  %s1356_s5 = inlined_call_operand.vmem [shape: bf16[128,4], index: 5, kind: input, shape index: {}]   ;;  %s1357_s6 = inlined_call_operand.vmem [shape: f32[1,4], index: 6, kind: input, shape index: {}]   ;;  %s1358_s7 = inlined_call_operand.vmem [shape: f32[312,4], index: 7, kind: output, shape index: {}]  }
   0x1 LB: > { %s856_s25 = sadd.s32 4294967295, %s1083_s24   ;;  %p860_p0 = scmp.ge.s32.totalorder %s1083_s24, 1  ;;  %s1083_s24 = sphi %s1127_s24, %s17_s24  }
   0x2   : > { %p238_p1 = scmp.lt.s32.totalorder %s1083_s24, 4 }
   0x4   : > { %p239_p2 = pnand %p860_p0, %p238_p1 }
   0x5   : > { %v1060_v0 = vld [vmem:[%s1352_s1] sm:$0xff] (!%p239_p2)   ;;  %v1085_v1 = vmov (!%p239_p2), 0.0   ;;  %s270_s28 = smul.u32 (!%p239_p2), 13, %s856_s25  ;;  %vm1086_vm0 = vmmov (!%p239_p2), 0   ;;  %vm318_vm1 = vcmask (!%p239_p2), 130048   ;;  %v1062_v13 = vld [vmem:[%s1354_s3 + $0x8] sm:$0xff] (!%p239_p2)  }
   0x6   : > { %242 = sbr.rel (%p239_p2) target bundleno = 722 (0x2d2), region = 48  ;;  %930 = vmatprep.subr.bf16.mxu0 (!%p239_p2), %v1085_v1  ;;  %1048 = vmatprep.subr.bf16.mxu1 (!%p239_p2), %v1085_v1  ;;  %v1061_v8 = vld [vmem:[%s1354_s3] sm:$0xff] (!%p239_p2)   ;;  %v1063_v16 = vld [vmem:[%s1354_s3 + $0x10] sm:$0xff] (!%p239_p2)   ;;  %v1064_v21 = vld [vmem:[%s1354_s3 + $0x18] sm:$0xff] (!%p239_p2)   ;;  %vm786_vm2 = vcmask (!%p239_p2), 31744  }
   0x7   : > { %931 = vmatpush3.bf16.msra.mxu0 (!%p239_p2), %v1060_v0  ;;  %932 = vmatprep.mubr.msk.bf16.mxu0 (!%p239_p2), %vm1086_vm0, %v1085_v1  ;;  %p271_p3 = scmp.lt.s32.totalorder (!%p239_p2), %s270_s28, 38  ;;  %v1065_v23 = vld [vmem:[%s1354_s3 + $0x20] sm:$0xff] (!%p239_p2)   ;;  %v1066_v27 = vld [vmem:[%s1354_s3 + $0x28] sm:$0xff] (!%p239_p2)   ;;  %v1067_v28 = vld [vmem:[%s1354_s3 + $0x30] sm:$0xff] (!%p239_p2)  }
   0x8   : > { %1049 = vmatpush3.bf16.msra.mxu1 (!%p239_p2), %v1060_v0  ;;  %948 = vmatprep.mubr.msk.bf16.mxu1 (!%p239_p2), %vm1086_vm0, %v1085_v1  ;;  %v1068_v29 = vld [vmem:[%s1354_s3 + $0x38] sm:$0xff] (!%p239_p2)   ;;  %v1069_v30 = vld [vmem:[%s1356_s5] sm:$0xff] (!%p239_p2)   ;;  %v1070_v31 = vld [vmem:[%s1356_s5 + $0x8] sm:$0xff] (!%p239_p2)  }
   0x9   : > { %960 = vmatprep.subr.bf16.mxu1 (!%p239_p2), %v1085_v1  ;;  %1004 = vmatprep.subr.bf16.mxu0 (!%p239_p2), %v1085_v1  ;;  %v1071_v32 = vld [vmem:[%s1356_s5 + $0x10] sm:$0xff] (!%p239_p2)   ;;  %v1072_v33 = vld [vmem:[%s1356_s5 + $0x18] sm:$0xff] (!%p239_p2)   ;;  %v1073_v34 = vld [vmem:[%s1356_s5 + $0x20] sm:$0xff] (!%p239_p2)  }
   0xa   : > { %v1074_v35 = vld [vmem:[%s1356_s5 + $0x28] sm:$0xff] (!%p239_p2)   ;;  %v1248_v36 = vld [vmem:[%s1353_s2] ss:$0 sm:$0xff] (!%p239_p2) }
   0xd   : > { %s1360_s28 = smov (!%p271_p3, %s270_s28), 38 }
   0xe   : > { %s861_s29 = sshll.u32 %s1360_s28, 3 }
   0xf   : > { %s1154_s9 = scalar_lea.vmem %s1351_s0, %s861_s29  ;;  %s1320_s10 = scalar_lea.vmem %s1358_s7, %s861_s29 }
  0x10   : > { %v283_v2 = vld [vmem:[%s1154_s9] sm:$0xff]  ;;  %v284_v3 = vld [vmem:[%s1154_s9 + $0x8] sm:$0xff]  ;;  %v285_v6 = vld [vmem:[%s1154_s9 + $0x10] sm:$0xff] }
  0x11   : > { %v296_v4 = vpack.c.bf16 %v284_v3, %v283_v2  ;;  %v291_v5 = vld [vmem:[%s1154_s9 + $0x40] sm:$0xff]  ;;  %v292_v7 = vld [vmem:[%s1154_s9 + $0x48] sm:$0xff]  ;;  %v286_v9 = vld [vmem:[%s1154_s9 + $0x18] sm:$0xff] }
  0x12   : > { %v300_v10 = vpack.c.bf16 %v292_v7, %v291_v5  ;;  %v293_v11 = vld [vmem:[%s1154_s9 + $0x50] sm:$0xff]  ;;  %v294_v12 = vld [vmem:[%s1154_s9 + $0x58] sm:$0xff]  ;;  %v297_v14 = vpack.c.bf16 %v286_v9, %v285_v6  ;;  %v287_v17 = vld [vmem:[%s1154_s9 + $0x20] sm:$0xff] }
  0x13   : > { %933 = vmatmul.mubr.msk.bf16.vlgmr.msra.gmra.mrb[0].mxu0 %vm318_vm1, %v296_v4  ;;  %v301_v15 = vpack.c.bf16 %v294_v12, %v293_v11  ;;  %v288_v18 = vld [vmem:[%s1154_s9 + $0x28] sm:$0xff]  ;;  %v295_v20 = vld [vmem:[%s1154_s9 + $0x60] sm:$0xff]  ;;  %v289_v24 = vld [vmem:[%s1154_s9 + $0x30] sm:$0xff] }
  0x14   : > { %936 = vmatprep.mubr.msk.bf16.mxu0 %vm1086_vm0, %v1085_v1  ;;  %949 = vmatmul.mubr.msk.bf16.vlgmr.msra.gmra.mrb[0].mxu1 %vm318_vm1, %v300_v10  ;;  %v298_v19 = vpack.c.bf16 %v288_v18, %v287_v17  ;;  %v302_v22 = vpack.c.bf16 %v295_v20, %v295_v20  ;;  %v290_v25 = vld [vmem:[%s1154_s9 + $0x38] sm:$0xff] }
  0x15   : > { %952 = vmatprep.mubr.msk.bf16.mxu1 %vm1086_vm0, %v1085_v1  ;;  %961 = vmatpush3.bf16.msra.mxu1 %v1061_v8  ;;  %v299_v26 = vpack.c.bf16 %v290_v25, %v289_v24 }
  0x16   : > { %962 = vmatprep.subr.bf16.mxu1 %v1085_v1  ;;  %1005 = vmatpush3.bf16.msra.mxu0 %v1069_v30 }
  0x17   : > { %1006 = vmatprep.subr.bf16.mxu0 %v1085_v1 }
  0x19   : > { %963 = vmatpush3.bf16.msra.mxu1 %v1062_v13 }
  0x1a   : > { %964 = vmatprep.subr.bf16.mxu1 %v1085_v1  ;;  %1007 = vmatpush3.bf16.msra.mxu0 %v1070_v31 }
  0x1b   : > { %937 = vmatmul.mubr.msk.bf16.gmra.mrb[4].mxu0 %vm318_vm1, %v297_v14  ;;  %1008 = vmatprep.subr.bf16.mxu0 %v1085_v1 }
  0x1c   : > { %940 = vmatprep.mubr.msk.bf16.mxu0 %vm1086_vm0, %v1085_v1  ;;  %953 = vmatmul.mubr.msk.bf16.gmra.mrb[4].mxu1 %vm318_vm1, %v301_v15 }
  0x1d   : > { %956 = vmatprep.mubr.msk.bf16.mxu1 %vm1086_vm0, %v1085_v1  ;;  %965 = vmatpush3.bf16.msra.mxu1 %v1063_v16 }
  0x1e   : > { %966 = vmatprep.subr.bf16.mxu1 %v1085_v1  ;;  %1009 = vmatpush3.bf16.msra.mxu0 %v1071_v32 }
  0x1f   : > { %1010 = vmatprep.subr.bf16.mxu0 %v1085_v1 }
  0x21   : > { %967 = vmatpush3.bf16.msra.mxu1 %v1064_v21 }
  0x22   : > { %968 = vmatprep.subr.bf16.mxu1 %v1085_v1  ;;  %1011 = vmatpush3.bf16.msra.mxu0 %v1072_v33 }
  0x23   : > { %941 = vmatmul.mubr.msk.bf16.gmra.mrb[8].mxu0 %vm318_vm1, %v298_v19  ;;  %1012 = vmatprep.subr.bf16.mxu0 %v1085_v1 }
  0x24   : > { %944 = vmatprep.mubr.msk.bf16.mxu0 %vm1086_vm0, %v1085_v1  ;;  %957 = vmatmul.mubr.msk.bf16.gmra.mrb[8].mxu1 %vm318_vm1, %v302_v22 }
  0x25   : > { %969 = vmatpush3.bf16.msra.mxu1 %v1065_v23  ;;  %976 = vmatprep.mubr.msk.bf16.mxu1 %vm1086_vm0, %v1085_v1 }
  0x26   : > { %970 = vmatprep.subr.bf16.mxu1 %v1085_v1  ;;  %1013 = vmatpush3.bf16.msra.mxu0 %v1073_v34 }
  0x27   : > { %1014 = vmatprep.subr.bf16.mxu0 %v1085_v1 }
  0x29   : > { %971 = vmatpush3.bf16.msra.mxu1 %v1066_v27 }
  0x2a   : > { %972 = vmatprep.subr.bf16.mxu1 %v1085_v1  ;;  %1015 = vmatpush3.bf16.msra.mxu0 %v1074_v35  ;;  %v1075_v35 = vld [vmem:[%s1356_s5 + $0x30] sm:$0xff]  }
  0x2b   : > { %945 = vmatmul.mubr.msk.bf16.gmra.mrb[12].mxu0 %vm318_vm1, %v299_v26  ;;  %1016 = vmatprep.subr.bf16.mxu0 %v1085_v1 }
  0x2c   : > { %1020 = vmatprep.mubr.msk.bf16.mxu0 %vm1086_vm0, %v1085_v1 }
  0x2d   : > { %973 = vmatpush3.bf16.msra.mxu1 %v1067_v28 }
  0x2e   : > { %974 = vmatprep.subr.bf16.mxu1 %v1085_v1  ;;  %1017 = vmatpush3.bf16.msra.mxu0 %v1075_v35 }
  0x2f   : > { %1018 = vmatprep.subr.bf16.mxu0 %v1085_v1 }
  0x31   : > { %975 = vmatpush3.bf16.msra.mxu1 %v1068_v29 }
  0xe6   : > { %v374_v37 = vpop.f32.mrb[0].mxu0 }
  0xe7   : > { %v375_v38 = vadd.f32 %v1248_v36, %v374_v37  ;;  %v934_v39 = vpop.f32.mrb[1].mxu0  ;;  %v406_v43 = vpop.f32.mrb[0].mxu1  ;;  %v1076_v37 = vld [vmem:[%s1356_s5 + $0x38] sm:$0xff]  }
  0xe8   : > { %v377_v40 = vpop.f32.mrb[2].mxu0  ;;  %v407_v44 = vadd.f32 %v1248_v36, %v406_v43  ;;  %v950_v45 = vpop.f32.mrb[1].mxu1  ;;  %1019 = vmatpush3.bf16.msra.mxu0 %v1076_v37  ;;  %v881_v37 = vld [vmem:[%s1357_s6] ss:$0 sm:$0xff] }
  0xe9   : > { %v378_v41 = vadd.f32 %v1248_v36, %v377_v40  ;;  %v935_v42 = vpop.f32.mrb[3].mxu0  ;;  %v428_v46 = vmax.f32 %v375_v38, 0.0  ;;  %v409_v48 = vpop.f32.mrb[2].mxu1 }
  0xea   : > { %v436_v49 = vmax.f32 %v407_v44, 0.0  ;;  %v410_v50 = vadd.f32 %v1248_v36, %v409_v48  ;;  %v951_v51 = vpop.f32.mrb[3].mxu1 }
  0xeb   : > { %v429_v47 = vmax.f32 %v378_v41, 0.0 }
  0xec   : > { %v437_v54 = vmax.f32 %v410_v50, 0.0 }
  0xed   : > { %v441_v52 = vpack.c.bf16 %v429_v47, %v428_v46 }
  0xee   : > { %v382_v53 = vpop.f32.mrb[4].mxu0  ;;  %v445_v58 = vpack.c.bf16 %v437_v54, %v436_v49 }
  0xef   : > { %v383_v55 = vadd.f32 %v1248_v36, %v382_v53  ;;  %v938_v56 = vpop.f32.mrb[5].mxu0  ;;  %977 = vmatmul.mubr.bf16.vlgmr.msra.gmra.mrb[12].mxu1 %v441_v52  ;;  %v414_v61 = vpop.f32.mrb[4].mxu1 }
  0xf0   : > { %v385_v57 = vpop.f32.mrb[6].mxu0  ;;  %980 = vmatprep.mubr.msk.bf16.mxu1 %vm1086_vm0, %v1085_v1  ;;  %v415_v62 = vadd.f32 %v1248_v36, %v414_v61  ;;  %v954_v63 = vpop.f32.mrb[5].mxu1 }
  0xf1   : > { %v386_v59 = vadd.f32 %v1248_v36, %v385_v57  ;;  %v939_v60 = vpop.f32.mrb[7].mxu0  ;;  %v430_v0 = vmax.f32 %v383_v55, 0.0  ;;  %v417_v3 = vpop.f32.mrb[6].mxu1 }
  0xf2   : > { %v438_v4 = vmax.f32 %v415_v62, 0.0  ;;  %v418_v5 = vadd.f32 %v1248_v36, %v417_v3  ;;  %v955_v6 = vpop.f32.mrb[7].mxu1 }
  0xf3   : > { %v431_v2 = vmax.f32 %v386_v59, 0.0 }
  0xf4   : > { %v439_v9 = vmax.f32 %v418_v5, 0.0 }
  0xf5   : > { %v442_v7 = vpack.c.bf16 %v431_v2, %v430_v0 }
  0xf6   : > { %v390_v8 = vpop.f32.mrb[8].mxu0  ;;  %v446_v13 = vpack.c.bf16 %v439_v9, %v438_v4 }
  0xf7   : > { %v391_v10 = vadd.f32 %v1248_v36, %v390_v8  ;;  %v942_v11 = vpop.f32.mrb[9].mxu0  ;;  %981 = vmatmul.mubr.bf16.gmra.mrb[16].mxu1 %v442_v7  ;;  %v422_v16 = vpop.f32.mrb[8].mxu1 }
  0xf8   : > { %v393_v12 = vpop.f32.mrb[10].mxu0  ;;  %984 = vmatprep.mubr.msk.bf16.mxu1 %vm1086_vm0, %v1085_v1  ;;  %v958_v17 = vpop.f32.mrb[9].mxu1  ;;  %v423_v32 = vadd.f32 %v1248_v36, %v422_v16 }
  0xf9   : > { %v394_v14 = vadd.f32 %v1248_v36, %v393_v12  ;;  %v943_v15 = vpop.f32.mrb[11].mxu0  ;;  %v432_v18 = vmax.f32 %v391_v10, 0.0  ;;  %v425_v20 = vpop.f32.mrb[10].mxu1 }
  0xfa   : > { %v959_v21 = vpop.f32.mrb[11].mxu1  ;;  %v440_v33 = vmax.f32 %v423_v32, 0.0 }
  0xfb   : > { %v433_v19 = vmax.f32 %v394_v14, 0.0 }
  0xfc   : > { %v447_v34 = vpack.c.bf16 %v440_v33, %v440_v33 }
  0xfd   : > { %v443_v22 = vpack.c.bf16 %v433_v19, %v432_v18 }
  0xfe   : > { %v398_v23 = vpop.f32.mrb[12].mxu0 }
  0xff   : > { %v399_v24 = vadd.f32 %v1248_v36, %v398_v23  ;;  %v946_v25 = vpop.f32.mrb[13].mxu0  ;;  %985 = vmatmul.mubr.bf16.gmra.mrb[20].mxu1 %v443_v22 }
 0x100   : > { %v401_v26 = vpop.f32.mrb[14].mxu0  ;;  %988 = vmatprep.mubr.msk.bf16.mxu1 %vm1086_vm0, %v1085_v1 }
 0x101   : > { %v402_v27 = vadd.f32 %v1248_v36, %v401_v26  ;;  %v947_v28 = vpop.f32.mrb[15].mxu0  ;;  %v434_v29 = vmax.f32 %v399_v24, 0.0  ;;  %v1285_v36 = vld [vmem:[%s1355_s4] ss:$0 sm:$0xff] }
 0x103   : > { %v435_v30 = vmax.f32 %v402_v27, 0.0 }
 0x105   : > { %v444_v31 = vpack.c.bf16 %v435_v30, %v434_v29 }
 0x107   : > { %989 = vmatmul.mubr.bf16.gmra.mrb[24].mxu1 %v444_v31 }
 0x108   : > { %992 = vmatprep.mubr.msk.bf16.mxu1 %vm1086_vm0, %v1085_v1 }
 0x10f   : > { %993 = vmatmul.mubr.bf16.gmra.mrb[28].mxu1 %v445_v58 }
 0x110   : > { %996 = vmatprep.mubr.msk.bf16.mxu1 %vm1086_vm0, %v1085_v1 }
 0x117   : > { %997 = vmatmul.mubr.bf16.gmra.mrb[32].mxu1 %v446_v13 }
 0x118   : > { %1000 = vmatprep.mubr.msk.bf16.mxu1 %vm1086_vm0, %v1085_v1 }
 0x11f   : > { %1001 = vmatmul.mubr.bf16.gmra.mrb[36].mxu1 %v447_v34 }
 0x1c2   : > { %v553_v38 = vpop.f32.mrb[12].mxu1 }
 0x1c3   : > { %v554_v39 = vadd.f32 %v1285_v36, %v553_v38  ;;  %v978_v40 = vpop.f32.mrb[13].mxu1 }
 0x1c4   : > { %v556_v41 = vpop.f32.mrb[14].mxu1 }
 0x1c5   : > { %v557_v42 = vadd.f32 %v1285_v36, %v556_v41  ;;  %v979_v43 = vpop.f32.mrb[15].mxu1  ;;  %v607_v44 = vmax.f32 %v554_v39, 0.0 }
 0x1c7   : > { %v608_v45 = vmax.f32 %v557_v42, 0.0 }
 0x1c9   : > { %v620_v46 = vpack.c.bf16 %v608_v45, %v607_v44 }
 0x1ca   : > { %v561_v47 = vpop.f32.mrb[16].mxu1 }
 0x1cb   : > { %v562_v48 = vadd.f32 %v1285_v36, %v561_v47  ;;  %v982_v49 = vpop.f32.mrb[17].mxu1  ;;  %1021 = vmatmul.mubr.bf16.vlgmr.msra.gmra.mrb[16].mxu0 %v620_v46 }
 0x1cc   : > { %v564_v50 = vpop.f32.mrb[18].mxu1  ;;  %1024 = vmatprep.mubr.msk.bf16.mxu0 %vm1086_vm0, %v1085_v1 }
 0x1cd   : > { %v565_v51 = vadd.f32 %v1285_v36, %v564_v50  ;;  %v983_v52 = vpop.f32.mrb[19].mxu1  ;;  %v609_v53 = vmax.f32 %v562_v48, 0.0 }
 0x1cf   : > { %v610_v54 = vmax.f32 %v565_v51, 0.0 }
 0x1d1   : > { %v621_v55 = vpack.c.bf16 %v610_v54, %v609_v53 }
 0x1d2   : > { %v569_v56 = vpop.f32.mrb[20].mxu1 }
 0x1d3   : > { %v570_v57 = vadd.f32 %v1285_v36, %v569_v56  ;;  %v986_v58 = vpop.f32.mrb[21].mxu1  ;;  %1025 = vmatmul.mubr.bf16.gmra.mrb[20].mxu0 %v621_v55 }
 0x1d4   : > { %v572_v59 = vpop.f32.mrb[22].mxu1  ;;  %1028 = vmatprep.mubr.msk.bf16.mxu0 %vm1086_vm0, %v1085_v1 }
 0x1d5   : > { %v573_v60 = vadd.f32 %v1285_v36, %v572_v59  ;;  %v987_v61 = vpop.f32.mrb[23].mxu1  ;;  %v611_v62 = vmax.f32 %v570_v57, 0.0 }
 0x1d7   : > { %v612_v63 = vmax.f32 %v573_v60, 0.0 }
 0x1d9   : > { %v622_v0 = vpack.c.bf16 %v612_v63, %v611_v62 }
 0x1da   : > { %v577_v2 = vpop.f32.mrb[24].mxu1 }
 0x1db   : > { %v578_v3 = vadd.f32 %v1285_v36, %v577_v2  ;;  %v990_v4 = vpop.f32.mrb[25].mxu1  ;;  %1029 = vmatmul.mubr.bf16.gmra.mrb[24].mxu0 %v622_v0 }
 0x1dc   : > { %v580_v5 = vpop.f32.mrb[26].mxu1  ;;  %1032 = vmatprep.mubr.msk.bf16.mxu0 %vm1086_vm0, %v1085_v1 }
 0x1dd   : > { %v581_v6 = vadd.f32 %v1285_v36, %v580_v5  ;;  %v991_v7 = vpop.f32.mrb[27].mxu1  ;;  %v613_v8 = vmax.f32 %v578_v3, 0.0 }
 0x1df   : > { %v614_v9 = vmax.f32 %v581_v6, 0.0 }
 0x1e1   : > { %v623_v10 = vpack.c.bf16 %v614_v9, %v613_v8 }
 0x1e2   : > { %v585_v11 = vpop.f32.mrb[28].mxu1 }
 0x1e3   : > { %v586_v12 = vadd.f32 %v1285_v36, %v585_v11  ;;  %v994_v13 = vpop.f32.mrb[29].mxu1  ;;  %1033 = vmatmul.mubr.bf16.gmra.mrb[28].mxu0 %v623_v10 }
 0x1e4   : > { %v588_v14 = vpop.f32.mrb[30].mxu1  ;;  %1036 = vmatprep.mubr.msk.bf16.mxu0 %vm1086_vm0, %v1085_v1 }
 0x1e5   : > { %v589_v15 = vadd.f32 %v1285_v36, %v588_v14  ;;  %v995_v16 = vpop.f32.mrb[31].mxu1  ;;  %v615_v17 = vmax.f32 %v586_v12, 0.0 }
 0x1e7   : > { %v616_v18 = vmax.f32 %v589_v15, 0.0 }
 0x1e9   : > { %v624_v19 = vpack.c.bf16 %v616_v18, %v615_v17 }
 0x1ea   : > { %v593_v20 = vpop.f32.mrb[32].mxu1 }
 0x1eb   : > { %v594_v21 = vadd.f32 %v1285_v36, %v593_v20  ;;  %v998_v22 = vpop.f32.mrb[33].mxu1  ;;  %1037 = vmatmul.mubr.bf16.gmra.mrb[32].mxu0 %v624_v19 }
 0x1ec   : > { %v596_v23 = vpop.f32.mrb[34].mxu1  ;;  %1040 = vmatprep.mubr.msk.bf16.mxu0 %vm1086_vm0, %v1085_v1 }
 0x1ed   : > { %v597_v24 = vadd.f32 %v1285_v36, %v596_v23  ;;  %v999_v25 = vpop.f32.mrb[35].mxu1  ;;  %v617_v26 = vmax.f32 %v594_v21, 0.0 }
 0x1ef   : > { %v618_v27 = vmax.f32 %v597_v24, 0.0 }
 0x1f1   : > { %v625_v28 = vpack.c.bf16 %v618_v27, %v617_v26 }
 0x1f2   : > { %v601_v29 = vpop.f32.mrb[36].mxu1 }
 0x1f3   : > { %v602_v30 = vadd.f32 %v1285_v36, %v601_v29  ;;  %v1002_v31 = vpop.f32.mrb[37].mxu1  ;;  %1041 = vmatmul.mubr.bf16.gmra.mrb[36].mxu0 %v625_v28 }
 0x1f4   : > { %v604_v32 = vpop.f32.mrb[38].mxu1  ;;  %1044 = vmatprep.mubr.msk.bf16.mxu0 %vm1086_vm0, %v1085_v1 }
 0x1f5   : > { %v619_v33 = vmax.f32 %v602_v30, 0.0  ;;  %v1003_v34 = vpop.f32.mrb[39].mxu1 }
 0x1f7   : > { %v626_v35 = vpack.c.bf16 %v619_v33, %v619_v33 }
 0x1fb   : > { %1045 = vmatmul.mubr.bf16.gmra.mrb[40].mxu0 %v626_v35 }
 0x29e   : > { %v732_v36 = vpop.f32.mrb[16].mxu0 }
 0x29f   : > { %v733_v1 = vadd.f32 %v881_v37, %v732_v36  ;;  %v1022_v38 = vpop.f32.mrb[17].mxu0 }
 0x2a0   : > { %v735_v39 = vpop.f32.mrb[18].mxu0 }
 0x2a1   : > { %787 = vst.msk [vmem:[%s1320_s10] sm:$0xff] %vm786_vm2, %v733_v1  ;;  %v736_v40 = vadd.f32 %v881_v37, %v735_v39  ;;  %v1023_v41 = vpop.f32.mrb[19].mxu0 }
 0x2a3   : > { %788 = vst.msk [vmem:[%s1320_s10 + $0x8] sm:$0xff] %vm786_vm2, %v736_v40 }
 0x2a6   : > { %v740_v42 = vpop.f32.mrb[20].mxu0 }
 0x2a7   : > { %v741_v43 = vadd.f32 %v881_v37, %v740_v42  ;;  %v1026_v44 = vpop.f32.mrb[21].mxu0 }
 0x2a8   : > { %v743_v45 = vpop.f32.mrb[22].mxu0 }
 0x2a9   : > { %789 = vst.msk [vmem:[%s1320_s10 + $0x10] sm:$0xff] %vm786_vm2, %v741_v43  ;;  %v744_v46 = vadd.f32 %v881_v37, %v743_v45  ;;  %v1027_v47 = vpop.f32.mrb[23].mxu0 }
 0x2ab   : > { %790 = vst.msk [vmem:[%s1320_s10 + $0x18] sm:$0xff] %vm786_vm2, %v744_v46 }
 0x2ae   : > { %v748_v48 = vpop.f32.mrb[24].mxu0 }
 0x2af   : > { %v749_v49 = vadd.f32 %v881_v37, %v748_v48  ;;  %v1030_v50 = vpop.f32.mrb[25].mxu0 }
 0x2b0   : > { %v751_v51 = vpop.f32.mrb[26].mxu0 }
 0x2b1   : > { %791 = vst.msk [vmem:[%s1320_s10 + $0x20] sm:$0xff] %vm786_vm2, %v749_v49  ;;  %v752_v52 = vadd.f32 %v881_v37, %v751_v51  ;;  %v1031_v53 = vpop.f32.mrb[27].mxu0 }
 0x2b3   : > { %792 = vst.msk [vmem:[%s1320_s10 + $0x28] sm:$0xff] %vm786_vm2, %v752_v52 }
 0x2b6   : > { %v756_v54 = vpop.f32.mrb[28].mxu0 }
 0x2b7   : > { %v757_v55 = vadd.f32 %v881_v37, %v756_v54  ;;  %v1034_v56 = vpop.f32.mrb[29].mxu0 }
 0x2b8   : > { %v759_v57 = vpop.f32.mrb[30].mxu0 }
 0x2b9   : > { %793 = vst.msk [vmem:[%s1320_s10 + $0x30] sm:$0xff] %vm786_vm2, %v757_v55  ;;  %v760_v58 = vadd.f32 %v881_v37, %v759_v57  ;;  %v1035_v59 = vpop.f32.mrb[31].mxu0 }
 0x2bb   : > { %794 = vst.msk [vmem:[%s1320_s10 + $0x38] sm:$0xff] %vm786_vm2, %v760_v58 }
 0x2be   : > { %v764_v60 = vpop.f32.mrb[32].mxu0 }
 0x2bf   : > { %v765_v61 = vadd.f32 %v881_v37, %v764_v60  ;;  %v1038_v62 = vpop.f32.mrb[33].mxu0 }
 0x2c0   : > { %v767_v63 = vpop.f32.mrb[34].mxu0 }
 0x2c1   : > { %795 = vst.msk [vmem:[%s1320_s10 + $0x40] sm:$0xff] %vm786_vm2, %v765_v61  ;;  %v768_v0 = vadd.f32 %v881_v37, %v767_v63  ;;  %v1039_v2 = vpop.f32.mrb[35].mxu0 }
 0x2c3   : > { %796 = vst.msk [vmem:[%s1320_s10 + $0x48] sm:$0xff] %vm786_vm2, %v768_v0 }
 0x2c6   : > { %v772_v3 = vpop.f32.mrb[36].mxu0 }
 0x2c7   : > { %v773_v4 = vadd.f32 %v881_v37, %v772_v3  ;;  %v1042_v5 = vpop.f32.mrb[37].mxu0 }
 0x2c8   : > { %v775_v6 = vpop.f32.mrb[38].mxu0 }
 0x2c9   : > { %797 = vst.msk [vmem:[%s1320_s10 + $0x50] sm:$0xff] %vm786_vm2, %v773_v4  ;;  %v776_v7 = vadd.f32 %v881_v37, %v775_v6  ;;  %v1043_v8 = vpop.f32.mrb[39].mxu0 }
 0x2cb   : > { %798 = vst.msk [vmem:[%s1320_s10 + $0x58] sm:$0xff] %vm786_vm2, %v776_v7 }
 0x2ce   : > { %v780_v9 = vpop.f32.mrb[40].mxu0 }
 0x2cf   : > { %v781_v10 = vadd.f32 %v881_v37, %v780_v9  ;;  %v1046_v11 = vpop.f32.mrb[41].mxu0 }
 0x2d0   : > { %v783_v12 = vpop.f32.mrb[42].mxu0 }
 0x2d1   : > { %799 = vst.msk [vmem:[%s1320_s10 + $0x60] sm:$0xff] %vm786_vm2, %v781_v10  ;;  %v1047_v13 = vpop.f32.mrb[43].mxu0 }
 0x2d2 PF: > { %s17_s24 = sadd.s32 1, %s1083_s24  }
 0x2d3   : > { %p14_p4 = scmp.ge.s32.totalorder %s17_s24, 5  }
 0x2d5   :  { %16 = sbr.rel (!%p14_p4) target bundleno = 1 (0x1), region = 78 }

</bundles_post_ra>
